<compile_context>
chip_gen: v5e
topology: v5e:2x2
jax: 0.10.0
libtpu: 0.0.40
codegen_flags: <defaults>
</compile_context>

<pallas_src>
import functools

import jax
import jax.numpy as jnp
from jax import lax
from jax.experimental import pallas as pl
from jax.experimental.pallas import tpu as pltpu


def _round_up(a: int, b: int) -> int:
    return ((a + b - 1) // b) * b


def _mosaiks1d_kernel(x_ref, w_ref, o_ref, *, Lp: int, inv_len: float):
    # x_ref: (TB*Lp, CK) bf16   w_ref: (CK, Kp) bf16   o_ref: (TB, Kp) f32
    TB, Kp = o_ref.shape
    y = jnp.dot(x_ref[...], w_ref[...], preferred_element_type=jnp.float32)
    y = jnp.maximum(y, 0.0)                                # ReLU in f32 (VPU)
    # Mean over the L conv positions: padded rows (l >= L) are exact zeros, so
    # an aligned reshape (Lp % 8 == 0, Kp % 128 == 0) + sum over axis 1 followed
    # by a 1/L scale (true L, f32) reproduces the PyTorch mean without the old
    # f32 averaging matmul.
    o_ref[...] = y.reshape(TB, Lp, Kp).sum(axis=1) * jnp.float32(inv_len)


def mosaiks1d_forward(x_btc: jax.Array, weight_kck: jax.Array) -> jax.Array:
    """x_btc: (batch, timestep, channel); weight: (k, in_channels, kernel_size)."""
    B, T, C = x_btc.shape
    K, Cin, KS = weight_kck.shape
    assert C == Cin
    L = T - KS + 1
    assert L >= 1, "timestep must be >= kernel_size (valid conv)"
    Lp = _round_up(L, 8)                       # sublane-aligned conv positions
    CK = C * KS
    Kp = _round_up(K, 128)                     # lane-dense output width

    # ---- batch tiling: big tiles (~1024 rows) to amortize per-step overhead ----
    target_rows = 1024
    if B <= 8:
        TB, B_pad = B, B                       # whole (small) batch in one tile
    else:
        TB = min(max(1, target_rows // Lp), (B + 1) // 2)   # keep >= 2 grid tiles
        TB = max(8, (TB // 8) * 8)             # sublane-aligned output tile
        B_pad = _round_up(B, TB)
    n_tiles = B_pad // TB

    # ---- wrapper-side layout prep (single XLA pass over x, no transpose) ----
    # im2col slab from native (B, T, C): x_col[b, l, j*C + c] = x[b, l + j, c];
    # zero-pad the batch to B_pad and the positions to Lp (all-zero windows).
    x_col = jnp.concatenate(
        [x_btc[:, j:j + L, :] for j in range(KS)], axis=-1)        # (B, L, CK)
    x_col = jnp.pad(x_col, ((0, B_pad - B), (0, Lp - L), (0, 0)))  # (B_pad, Lp, CK)
    x2d = x_col.reshape(B_pad * Lp, CK).astype(jnp.bfloat16)

    # weight -> (CK, Kp): w_col[j*C + c, k] = w[k, c, j]; pad K lanes to Kp.
    w_col = jnp.transpose(weight_kck, (2, 1, 0)).reshape(CK, K)
    w_col = jnp.pad(w_col, ((0, 0), (0, Kp - K))).astype(jnp.bfloat16)

    # ---- VMEM budget & advisory cost for the chosen tiles ----
    vmem_needed = (2 * TB * Lp * CK * 2        # double-buffered x tile (bf16)
                   + CK * Kp * 2               # single-buffered resident weight
                   + 2 * TB * Kp * 4)          # double-buffered output tile (f32)
    vmem_limit = int(min(max(vmem_needed + (2 << 20), 8 << 20), 64 << 20))
    cost = pl.CostEstimate(
        flops=2 * B_pad * Lp * CK * Kp,
        transcendentals=0,
        bytes_accessed=int(x2d.size * 2 + w_col.size * 2 + B_pad * Kp * 4),
    )

    out = pl.pallas_call(
        functools.partial(_mosaiks1d_kernel, Lp=Lp, inv_len=1.0 / L),
        out_shape=jax.ShapeDtypeStruct((B_pad, Kp), jnp.float32),
        grid=(n_tiles,),
        in_specs=[
            pl.BlockSpec((TB * Lp, CK), lambda i: (i, 0)),          # batch tile of x
            pl.BlockSpec((CK, Kp), lambda i: (0, 0),
                         pipeline_mode=pl.Buffered(buffer_count=1)),  # resident weight
        ],
        out_specs=pl.BlockSpec((TB, Kp), lambda i: (i, 0)),
        compiler_params=pltpu.CompilerParams(
            dimension_semantics=("parallel",),
            vmem_limit_bytes=vmem_limit),
        cost_estimate=cost,
    )(x2d, w_col)

    return out[:B, :K]


def _reference(x_btc, weight_kck):
    # Ground-truth f32 path matching the PyTorch module exactly.
    x_bct = jnp.transpose(x_btc, (0, 2, 1)).astype(jnp.float32)
    y = lax.conv_general_dilated(
        x_bct,
        weight_kck.astype(jnp.float32),
        window_strides=(1,),
        padding="VALID",
        dimension_numbers=("NCH", "OIH", "NCH"),
        precision=lax.Precision.HIGHEST,
    )
    return jnp.mean(jnp.maximum(y, 0.0), axis=-1)


if __name__ == "__main__":
    # Small shapes consistent with the module's forward.
    batch, timestep, in_channels = 2, 16, 4
    k, kernel_size = 32, 3

    key = jax.random.PRNGKey(0)
    kx, kw = jax.random.split(key)
    x = jax.random.normal(kx, (batch, timestep, in_channels), dtype=jnp.float32)
    # Deterministic synthetic Conv1d weight (same shape as nn.Conv1d.weight),
    # scaled roughly like kaiming-uniform bound 1/sqrt(C*KS).
    bound = 1.0 / jnp.sqrt(jnp.float32(in_channels * kernel_size))
    weight = jax.random.uniform(
        kw, (k, in_channels, kernel_size), dtype=jnp.float32,
        minval=-bound, maxval=bound,
    )

    out = jax.block_until_ready(mosaiks1d_forward(x, weight))
    ref = jax.block_until_ready(_reference(x, weight))
    assert out.shape == (batch, k)
    # bf16 MXU inputs with f32 accumulation -> compare against the pure-f32
    # reference with a correspondingly loose tolerance.
    assert jnp.allclose(out, ref, atol=5e-2, rtol=5e-2), "mismatch vs reference"

    # Also exercise the multi-tile (B > 8, padded batch) path.
    batch2 = 20
    x2 = jax.random.normal(
        jax.random.PRNGKey(1), (batch2, timestep, in_channels), dtype=jnp.float32)
    out2 = jax.block_until_ready(mosaiks1d_forward(x2, weight))
    ref2 = jax.block_until_ready(_reference(x2, weight))
    assert out2.shape == (batch2, k)
    assert jnp.allclose(out2, ref2, atol=5e-2, rtol=5e-2), "mismatch (tiled path)"

    print("KERNEL_OK")
</pallas_src>

<mosaic_0001>
module attributes {stable_mosaic.version = 11 : i64} {
  func.func @_mosaiks1d_kernel(%arg0: i32, %arg1: memref<32x12xbf16, #tpu.memory_space<vmem>>, %arg2: memref<12x128xbf16, #tpu.memory_space<vmem>>, %arg3: memref<2x128xf32, #tpu.memory_space<vmem>>) attributes {dimension_semantics = [#tpu.dimension_semantics<parallel>], iteration_bounds = array<i64: 1>, scalar_prefetch = 0 : i64, scratch_operands = 0 : i64, tpu.core_type = #tpu.core_type<tc>, window_params = [{transform_indices = @transform_0, window_bounds = array<i64: 32, 12>}, {pipeline_mode = #tpu.pipeline_mode<synchronous>, transform_indices = @transform_1, window_bounds = array<i64: 12, 128>}, {transform_indices = @transform_2, window_bounds = array<i64: 2, 128>}]} {
    %c0 = arith.constant 0 : index
    %c0_0 = arith.constant 0 : index
    %0 = vector.load %arg1[%c0, %c0_0] : memref<32x12xbf16, #tpu.memory_space<vmem>>, vector<32x12xbf16>
    %c0_1 = arith.constant 0 : index
    %c0_2 = arith.constant 0 : index
    %1 = vector.load %arg2[%c0_1, %c0_2] : memref<12x128xbf16, #tpu.memory_space<vmem>>, vector<12x128xbf16>
    %cst = arith.constant dense<0.000000e+00> : vector<32x128xf32>
    %2 = tpu.matmul %0, %1, %cst {dimension_numbers = #tpu.dot_dimension_numbers<[1], [0], [0], [1], [0, 0, 1, 1], [], []>} : vector<32x12xbf16>, vector<12x128xbf16>, vector<32x128xf32> -> vector<32x128xf32>
    %cst_3 = arith.constant 0.000000e+00 : f32
    %3 = vector.broadcast %cst_3 : f32 to vector<32x128xf32>
    %4 = arith.maximumf %2, %3 : vector<32x128xf32>
    %5 = vector.shape_cast %4 : vector<32x128xf32> to vector<2x16x128xf32>
    %cst_4 = arith.constant dense<0.000000e+00> : vector<2x128xf32>
    %6 = vector.multi_reduction <add>, %5, %cst_4 [1] : vector<2x16x128xf32> to vector<2x128xf32>
    %cst_5 = arith.constant 0.0714285746 : f32
    %7 = vector.broadcast %cst_5 : f32 to vector<2x128xf32>
    %8 = arith.mulf %6, %7 : vector<2x128xf32>
    %c0_6 = arith.constant 0 : index
    %c0_7 = arith.constant 0 : index
    %9 = vector.load %arg3[%c0_6, %c0_7] : memref<2x128xf32, #tpu.memory_space<vmem>>, vector<2x128xf32>
    tpu.vector_store %arg3[%c0_6, %c0_7], %8 {strides = array<i32>} : memref<2x128xf32, #tpu.memory_space<vmem>>, vector<2x128xf32>,
    return
  }
  func.func @transform_0(%arg0: i32) -> (i32, i32) {
    %c0_i32 = arith.constant 0 : i32
    %c0_i32_0 = arith.constant 0 : i32
    return %arg0, %c0_i32 : i32, i32
  }
  func.func @transform_1(%arg0: i32) -> (i32, i32) {
    %c0_i32 = arith.constant 0 : i32
    %c0_i32_0 = arith.constant 0 : i32
    %c0_i32_1 = arith.constant 0 : i32
    return %c0_i32, %c0_i32_0 : i32, i32
  }
  func.func @transform_2(%arg0: i32) -> (i32, i32) {
    %c0_i32 = arith.constant 0 : i32
    %c0_i32_0 = arith.constant 0 : i32
    return %arg0, %c0_i32 : i32, i32
  }
}

</mosaic_0001>

<bundles_post_ra>
// kernel: tpu_custom_call.1
= control target key start
LH: loop header
LB: loop body
LE: loop exit
PB: predicated region body
PF: predicated region fallthrough
CT: control target
= control target key end

     0   :  { %vm41_vm0 = vcmask 1045504   ;;  %s182_s0 = inlined_call_operand.vmem [shape: bf16[32,12], index: 0, kind: input, shape index: {}]   ;;  %s183_s1 = inlined_call_operand.vmem [shape: bf16[12,128], index: 1, kind: input, shape index: {}]   ;;  %s184_s2 = inlined_call_operand.hbm [shape: f32[2,128], index: 2, kind: output, shape index: {}]  }
   0x1   :  { %v116_v0 = vld [vmem:[%s183_s1] sm:$0xf]  ;;  %v122_v1 = vld [vmem:[%s183_s1] sm:$0x30] }
   0x2   :  { %v117_v2 = vor.u32 %v122_v1, %v116_v0 }
   0x3   :  { %7 = vsyncpa [#allocation3], 0  ;;  %v120_v4 = vld [vmem:[%s182_s0] sm:$0xff]  ;;  %v121_v5 = vld [vmem:[%s182_s0 + $0x8] sm:$0xff]  ;;  %vm34_vm1 = vcmask 97280   ;;  %s151_s0 = smov [#allocation2]  }
   0x4   :  { %v43_v3 = vsel %vm41_vm0, %v117_v2, 0  ;;  %s95_s1 = sshll.u32 %s151_s0, 4  ;;  %s97_s19 = sshll.u32 %s184_s2, 4  ;;  %vm86_vm2 = vcmask 1041409   ;;  %s96_s1 = int_to_ptr.vmem [resolvable:$true] %s95_s1  ;;  %s98_s19 = int_to_ptr.hbm [resolvable:$true] %s97_s19 }
   0x5   :  { %52 = vmatpush.bf16.msra.mxu0 %v43_v3  ;;  %123 = vmatpush.bf16.msra.mxu1 %v43_v3 }
   0x8   :  { %118 = vmatmul.msk.bf16.vlgmr.msra.gmra.mxu0 %vm34_vm1, %v120_v4  ;;  %119 = vmatmul.msk.bf16.vlgmr.msra.gmra.mxu1 %vm34_vm1, %v121_v5 }
  0x85   :  { %v54_v6 = vpop.f32.mrf.mxu0  ;;  %v59_v7 = vpop.f32.mrf.mxu1 }
  0x86   :  { %v64_v10 = vmax.f32 %v54_v6, 0.0  ;;  %v66_v11 = vmax.f32 %v59_v7, 0.0 }
  0x8d   :  { %v56_v8 = vpop.f32.mrf.mxu0  ;;  %v61_v9 = vpop.f32.mrf.mxu1 }
  0x8e   :  { %v65_v12 = vmax.f32 %v56_v8, 0.0  ;;  %v67_v13 = vmax.f32 %v61_v9, 0.0 }
  0x90   :  { %v68_v14 = vadd.f32 %v65_v12, %v64_v10  ;;  %v75_v15 = vadd.f32 %v67_v13, %v66_v11 }
  0x92   :  { %v69_v16 = vrot.slane %v68_v14, 4  ;;  %v76_v17 = vrot.slane %v75_v15, 4 }
  0x94   :  { %v70_v18 = vadd.f32 %v69_v16, %v68_v14  ;;  %v77_v19 = vadd.f32 %v76_v17, %v75_v15 }
  0x96   :  { %v71_v20 = vrot.slane %v70_v18, 2  ;;  %v78_v21 = vrot.slane %v77_v19, 2 }
  0x98   :  { %v72_v22 = vadd.f32 %v71_v20, %v70_v18  ;;  %v79_v23 = vadd.f32 %v78_v21, %v77_v19 }
  0x9a   :  { %v73_v24 = vrot.slane %v72_v22, 1  ;;  %v80_v25 = vrot.slane %v79_v23, 1 }
  0x9c   :  { %v74_v26 = vadd.f32 %v73_v24, %v72_v22  ;;  %v81_v27 = vadd.f32 %v80_v25, %v79_v23 }
  0x9e   :  { %v82_v28 = vmul.f32 0.071428575, %v74_v26  ;;  %v83_v29 = vmul.f32 0.071428575, %v81_v27 }
  0xa0   :  { %v87_v30 = vsel %vm86_vm2, %v83_v29, %v82_v28 }
  0xa1   :  { %89 = vst [vmem:[#allocation2] sm:$0x3] %v87_v30 }
  0xa2   :  { %100 = dma.vmem_to_hbm [thread:$0]  %s96_s1, 32, %s98_s19, [#allocation3]  }
  0xa3   :  { %149 = dma.done.wait [#allocation3], 32  }
  0xa4   :  { %150 = vsyncadd [#allocation3], 4294967264 }
  0xa5   :  { %105 = vsyncpa [#allocation3], 1 }

</bundles_post_ra>
